<compile_context>
chip_gen: v5e
topology: v5e:2x2
jax: 0.10.0
libtpu: 0.0.40
codegen_flags: <defaults>
</compile_context>

<pallas_src>
import functools

import jax
import jax.numpy as jnp
from jax.experimental import pallas as pl
from jax.experimental.pallas import tpu as pltpu


def _round_up(x, m):
    return (x + m - 1) // m * m


def _vmem_budget_bytes():
    """Per-generation cap for the double-buffered streamed-input footprint."""
    cap = 64 << 20  # conservative fallback: v7x per-core physical VMEM
    try:
        cap = pltpu.get_tpu_info().vmem_capacity_bytes
    except Exception:
        pass
    return min(24 << 20, cap // 2)


def _mse_kernel(p_ref, l_ref, o_ref, acc_ref, *, n_features, tn, ragged):
    """Accumulate lane-dense per-row sums of squared diffs; finalize to mean."""
    k = pl.program_id(1)  # feature (reduction) axis, last in the grid

    @pl.when(k == 0)
    def _():
        acc_ref[...] = jnp.zeros_like(acc_ref)

    bt = acc_ref.shape[0]
    partial = jnp.zeros((bt, 128), jnp.float32)
    if ragged:
        # Hoisted once per grid step (JAX does not CSE broadcast_in_dim).
        lane = jax.lax.broadcasted_iota(jnp.int32, (bt, 128), 1)
        rem = n_features - k * tn  # number of valid lanes left in this block
    # Fused fold: per 128-lane static slice do load -> upcast -> sub ->
    # (mask) -> square -> add.  Pure VPU work; the single XLU reduce happens
    # once per batch block in the finalizer below.
    for j in range(tn // 128):
        d = (p_ref[:, j * 128:(j + 1) * 128].astype(jnp.float32)
             - l_ref[:, j * 128:(j + 1) * 128].astype(jnp.float32))
        if ragged:
            # Zero out-of-range lanes BEFORE squaring: the tail of a partial
            # block is unspecified (possibly NaN/Inf) and must not propagate.
            d = jnp.where(lane < rem - j * 128, d, 0.0)
        partial = partial + d * d
    acc_ref[...] += partial

    @pl.when(k == pl.num_programs(1) - 1)
    def _():
        o_ref[...] = jnp.sum(acc_ref[...], axis=1, keepdims=True) * (
            1.0 / n_features)


def mse_loss(pred, label, *, batch_tile=256, feat_tile=None):
    """Per-sample MSE. pred: (B, ...), label: any shape with the same numel."""
    b = pred.shape[0]
    p2 = jnp.reshape(pred, (b, -1))            # (B, N), dtype preserved
    n = p2.shape[1]
    l2 = jnp.reshape(label, (b, n))            # == label.view(pred.size()); own dtype
    p_item = jnp.dtype(p2.dtype).itemsize
    l_item = jnp.dtype(l2.dtype).itemsize

    # --- batch tile ----------------------------------------------------------
    # Sublane packing (second-to-last block dim): 8 rows for 32-bit dtypes,
    # 16 for 16-bit, 32 for 8-bit; honor the stricter of the two inputs.
    sub = max(8 * max(1, 4 // p_item), 8 * max(1, 4 // l_item))
    batch_tile = max(sub, _round_up(batch_tile, sub))
    if b <= batch_tile:
        # Block dim == full array dim is exempt from the (8,128) rule: small
        # batches are read exactly once, with no padded rows in HBM.
        bt = b
        if b >= 2 * sub:
            # Give the "parallel" batch axis >=2 steps so both v7x TensorCores
            # get work; a partial last block reads no extra HBM rows.
            bt = _round_up(pl.cdiv(b, 2), sub)
    else:
        bt = batch_tile

    # --- feature tile --------------------------------------------------------
    MAX_LANE_SLICES = 128          # bound on the unrolled in-kernel fold length
    budget = _vmem_budget_bytes()
    # Double-buffered footprint of the two streamed inputs: 2 * bt*tn*(p+l).
    tn_fit = max(128, budget // (2 * bt * (p_item + l_item)) // 128 * 128)
    tn = min(_round_up(n, 128), tn_fit, MAX_LANE_SLICES * 128)
    if feat_tile is not None:
        tn = min(tn, max(128, _round_up(feat_tile, 128)))
    ragged = (n % tn) != 0

    grid = (pl.cdiv(b, bt), pl.cdiv(n, tn))
    kernel = functools.partial(_mse_kernel, n_features=n, tn=tn, ragged=ragged)

    in_footprint = 2 * bt * tn * (p_item + l_item) + bt * 128 * 4
    vmem_limit = int(min(40 << 20, max(in_footprint + (4 << 20), 16 << 20)))

    cost = pl.CostEstimate(
        flops=3 * b * n,
        transcendentals=0,
        bytes_accessed=b * n * (p_item + l_item) + b * 4,
    )

    out = pl.pallas_call(
        kernel,
        out_shape=jax.ShapeDtypeStruct((b, 1), jnp.float32),
        grid_spec=pltpu.PrefetchScalarGridSpec(
            num_scalar_prefetch=0,
            grid=grid,
            in_specs=[
                pl.BlockSpec((bt, tn), lambda i, k: (i, k)),
                pl.BlockSpec((bt, tn), lambda i, k: (i, k)),
            ],
            out_specs=pl.BlockSpec((bt, 1), lambda i, k: (i, 0)),
            scratch_shapes=[pltpu.VMEM((bt, 128), jnp.float32)],
        ),
        compiler_params=pltpu.CompilerParams(
            dimension_semantics=("parallel", "arbitrary"),
            vmem_limit_bytes=vmem_limit,
        ),
        cost_estimate=cost,
    )(p2, l2)

    return out[:, 0]                               # (B,)


if __name__ == "__main__":
    key = jax.random.PRNGKey(0)
    k1, k2, k3, k4 = jax.random.split(key, 4)

    # --- main check: NCHW pred, flattened label (exercises the .view path) ---
    B, C, H, W = 2, 4, 16, 16
    pred = jax.random.normal(k1, (B, C, H, W), dtype=jnp.float32)
    label = jax.random.normal(k2, (B, C * H * W), dtype=jnp.float32)

    loss = jax.block_until_ready(mse_loss(pred, label))
    ref = jnp.mean((pred - label.reshape(pred.shape)) ** 2, axis=(1, 2, 3))
    assert loss.shape == (B,)
    assert jnp.allclose(loss, ref, rtol=1e-5, atol=1e-6), (loss, ref)

    # --- ragged path: feature count (3*5*7=105) not a multiple of 128 --------
    pred2 = jax.random.normal(k3, (2, 3, 5, 7), dtype=jnp.float32)
    label2 = jax.random.normal(k4, (2, 3, 5, 7), dtype=jnp.float32)
    loss2 = jax.block_until_ready(mse_loss(pred2, label2))
    ref2 = jnp.mean((pred2 - label2) ** 2, axis=(1, 2, 3))
    assert jnp.allclose(loss2, ref2, rtol=1e-5, atol=1e-6), (loss2, ref2)

    # --- bf16 pass-through (halves HBM traffic; accumulation stays f32) ------
    pred_bf = pred.astype(jnp.bfloat16)
    label_bf = label.astype(jnp.bfloat16)
    loss_bf = jax.block_until_ready(mse_loss(pred_bf, label_bf))
    ref_bf = jnp.mean(
        (pred_bf.astype(jnp.float32)
         - label_bf.astype(jnp.float32).reshape(pred.shape)) ** 2,
        axis=(1, 2, 3),
    )
    assert jnp.allclose(loss_bf, ref_bf, rtol=1e-3, atol=1e-4), (loss_bf, ref_bf)

    # --- mixed dtypes: bf16 pred vs f32 label (label keeps its own dtype) ----
    loss_mx = jax.block_until_ready(mse_loss(pred_bf, label))
    ref_mx = jnp.mean(
        (pred_bf.astype(jnp.float32) - label.reshape(pred.shape)) ** 2,
        axis=(1, 2, 3),
    )
    assert jnp.allclose(loss_mx, ref_mx, rtol=1e-3, atol=1e-4), (loss_mx, ref_mx)

    print("KERNEL_OK")
</pallas_src>

<mosaic_0001>
module attributes {stable_mosaic.version = 11 : i64} {
  func.func @_mse_kernel(%arg0: i32, %arg1: i32, %arg2: memref<2x1024xf32, #tpu.memory_space<vmem>>, %arg3: memref<2x1024xf32, #tpu.memory_space<vmem>>, %arg4: memref<2x1xf32, #tpu.memory_space<vmem>>, %arg5: memref<2x128xf32, #tpu.memory_space<vmem>>) attributes {dimension_semantics = [#tpu.dimension_semantics<parallel>, #tpu.dimension_semantics<arbitrary>], iteration_bounds = array<i64: 1, 1>, scalar_prefetch = 0 : i64, scratch_operands = 1 : i64, tpu.core_type = #tpu.core_type<tc>, window_params = [{transform_indices = @transform_0, window_bounds = array<i64: 2, 1024>}, {transform_indices = @transform_1, window_bounds = array<i64: 2, 1024>}, {transform_indices = @transform_2, window_bounds = array<i64: 2, 1>}]} {
    %c0_i32 = arith.constant 0 : i32
    %0 = arith.cmpi eq, %arg1, %c0_i32 : i32
    %1 = arith.extui %0 : i1 to i32
    %c0_i32_0 = arith.constant 0 : i32
    %2 = arith.cmpi ne, %1, %c0_i32_0 : i32
    scf.if %2 {
      %cst_31 = arith.constant 0.000000e+00 : f32
      %50 = vector.broadcast %cst_31 : f32 to vector<2x128xf32>
      %c0_32 = arith.constant 0 : index
      %c0_33 = arith.constant 0 : index
      %51 = vector.load %arg5[%c0_32, %c0_33] : memref<2x128xf32, #tpu.memory_space<vmem>>, vector<2x128xf32>
      tpu.vector_store %arg5[%c0_32, %c0_33], %50 {strides = array<i32>} : memref<2x128xf32, #tpu.memory_space<vmem>>, vector<2x128xf32>,
    } else {
    }
    %cst = arith.constant 0.000000e+00 : f32
    %3 = vector.broadcast %cst : f32 to vector<2x128xf32>
    %c0 = arith.constant 0 : index
    %c0_1 = arith.constant 0 : index
    %4 = vector.load %arg2[%c0, %c0_1] : memref<2x1024xf32, #tpu.memory_space<vmem>>, vector<2x128xf32>
    %c0_2 = arith.constant 0 : index
    %c0_3 = arith.constant 0 : index
    %5 = vector.load %arg3[%c0_2, %c0_3] : memref<2x1024xf32, #tpu.memory_space<vmem>>, vector<2x128xf32>
    %6 = arith.subf %4, %5 : vector<2x128xf32>
    %7 = arith.mulf %6, %6 : vector<2x128xf32>
    %8 = arith.addf %3, %7 : vector<2x128xf32>
    %c0_4 = arith.constant 0 : index
    %c128 = arith.constant 128 : index
    %9 = vector.load %arg2[%c0_4, %c128] : memref<2x1024xf32, #tpu.memory_space<vmem>>, vector<2x128xf32>
    %c0_5 = arith.constant 0 : index
    %c128_6 = arith.constant 128 : index
    %10 = vector.load %arg3[%c0_5, %c128_6] : memref<2x1024xf32, #tpu.memory_space<vmem>>, vector<2x128xf32>
    %11 = arith.subf %9, %10 : vector<2x128xf32>
    %12 = arith.mulf %11, %11 : vector<2x128xf32>
    %13 = arith.addf %8, %12 : vector<2x128xf32>
    %c0_7 = arith.constant 0 : index
    %c256 = arith.constant 256 : index
    %14 = vector.load %arg2[%c0_7, %c256] : memref<2x1024xf32, #tpu.memory_space<vmem>>, vector<2x128xf32>
    %c0_8 = arith.constant 0 : index
    %c256_9 = arith.constant 256 : index
    %15 = vector.load %arg3[%c0_8, %c256_9] : memref<2x1024xf32, #tpu.memory_space<vmem>>, vector<2x128xf32>
    %16 = arith.subf %14, %15 : vector<2x128xf32>
    %17 = arith.mulf %16, %16 : vector<2x128xf32>
    %18 = arith.addf %13, %17 : vector<2x128xf32>
    %c0_10 = arith.constant 0 : index
    %c384 = arith.constant 384 : index
    %19 = vector.load %arg2[%c0_10, %c384] : memref<2x1024xf32, #tpu.memory_space<vmem>>, vector<2x128xf32>
    %c0_11 = arith.constant 0 : index
    %c384_12 = arith.constant 384 : index
    %20 = vector.load %arg3[%c0_11, %c384_12] : memref<2x1024xf32, #tpu.memory_space<vmem>>, vector<2x128xf32>
    %21 = arith.subf %19, %20 : vector<2x128xf32>
    %22 = arith.mulf %21, %21 : vector<2x128xf32>
    %23 = arith.addf %18, %22 : vector<2x128xf32>
    %c0_13 = arith.constant 0 : index
    %c512 = arith.constant 512 : index
    %24 = vector.load %arg2[%c0_13, %c512] : memref<2x1024xf32, #tpu.memory_space<vmem>>, vector<2x128xf32>
    %c0_14 = arith.constant 0 : index
    %c512_15 = arith.constant 512 : index
    %25 = vector.load %arg3[%c0_14, %c512_15] : memref<2x1024xf32, #tpu.memory_space<vmem>>, vector<2x128xf32>
    %26 = arith.subf %24, %25 : vector<2x128xf32>
    %27 = arith.mulf %26, %26 : vector<2x128xf32>
    %28 = arith.addf %23, %27 : vector<2x128xf32>
    %c0_16 = arith.constant 0 : index
    %c640 = arith.constant 640 : index
    %29 = vector.load %arg2[%c0_16, %c640] : memref<2x1024xf32, #tpu.memory_space<vmem>>, vector<2x128xf32>
    %c0_17 = arith.constant 0 : index
    %c640_18 = arith.constant 640 : index
    %30 = vector.load %arg3[%c0_17, %c640_18] : memref<2x1024xf32, #tpu.memory_space<vmem>>, vector<2x128xf32>
    %31 = arith.subf %29, %30 : vector<2x128xf32>
    %32 = arith.mulf %31, %31 : vector<2x128xf32>
    %33 = arith.addf %28, %32 : vector<2x128xf32>
    %c0_19 = arith.constant 0 : index
    %c768 = arith.constant 768 : index
    %34 = vector.load %arg2[%c0_19, %c768] : memref<2x1024xf32, #tpu.memory_space<vmem>>, vector<2x128xf32>
    %c0_20 = arith.constant 0 : index
    %c768_21 = arith.constant 768 : index
    %35 = vector.load %arg3[%c0_20, %c768_21] : memref<2x1024xf32, #tpu.memory_space<vmem>>, vector<2x128xf32>
    %36 = arith.subf %34, %35 : vector<2x128xf32>
    %37 = arith.mulf %36, %36 : vector<2x128xf32>
    %38 = arith.addf %33, %37 : vector<2x128xf32>
    %c0_22 = arith.constant 0 : index
    %c896 = arith.constant 896 : index
    %39 = vector.load %arg2[%c0_22, %c896] : memref<2x1024xf32, #tpu.memory_space<vmem>>, vector<2x128xf32>
    %c0_23 = arith.constant 0 : index
    %c896_24 = arith.constant 896 : index
    %40 = vector.load %arg3[%c0_23, %c896_24] : memref<2x1024xf32, #tpu.memory_space<vmem>>, vector<2x128xf32>
    %41 = arith.subf %39, %40 : vector<2x128xf32>
    %42 = arith.mulf %41, %41 : vector<2x128xf32>
    %43 = arith.addf %38, %42 : vector<2x128xf32>
    %c0_25 = arith.constant 0 : index
    %c0_26 = arith.constant 0 : index
    %44 = vector.load %arg5[%c0_25, %c0_26] : memref<2x128xf32, #tpu.memory_space<vmem>>, vector<2x128xf32>
    %45 = arith.addf %44, %43 : vector<2x128xf32>
    %c0_27 = arith.constant 0 : index
    %c0_28 = arith.constant 0 : index
    %46 = vector.load %arg5[%c0_27, %c0_28] : memref<2x128xf32, #tpu.memory_space<vmem>>, vector<2x128xf32>
    tpu.vector_store %arg5[%c0_27, %c0_28], %45 {strides = array<i32>} : memref<2x128xf32, #tpu.memory_space<vmem>>, vector<2x128xf32>,
    %c0_i32_29 = arith.constant 0 : i32
    %47 = arith.cmpi eq, %arg1, %c0_i32_29 : i32
    %48 = arith.extui %47 : i1 to i32
    %c0_i32_30 = arith.constant 0 : i32
    %49 = arith.cmpi ne, %48, %c0_i32_30 : i32
    scf.if %49 {
      %c0_31 = arith.constant 0 : index
      %c0_32 = arith.constant 0 : index
      %50 = vector.load %arg5[%c0_31, %c0_32] : memref<2x128xf32, #tpu.memory_space<vmem>>, vector<2x128xf32>
      %cst_33 = arith.constant dense<0.000000e+00> : vector<2xf32>
      %51 = vector.multi_reduction <add>, %50, %cst_33 [1] : vector<2x128xf32> to vector<2xf32>
      %52 = vector.shape_cast %51 : vector<2xf32> to vector<2x1xf32>
      %cst_34 = arith.constant 9.765625E-4 : f32
      %53 = vector.broadcast %cst_34 : f32 to vector<2x1xf32>
      %54 = arith.mulf %52, %53 : vector<2x1xf32>
      %c0_35 = arith.constant 0 : index
      %c0_36 = arith.constant 0 : index
      %55 = vector.load %arg4[%c0_35, %c0_36] : memref<2x1xf32, #tpu.memory_space<vmem>>, vector<2x1xf32>
      tpu.vector_store %arg4[%c0_35, %c0_36], %54 {strides = array<i32>} : memref<2x1xf32, #tpu.memory_space<vmem>>, vector<2x1xf32>,
    } else {
    }
    return
  }
  func.func @transform_0(%arg0: i32, %arg1: i32) -> (i32, i32) {
    %c0_i32 = arith.constant 0 : i32
    return %arg0, %arg1 : i32, i32
  }
  func.func @transform_1(%arg0: i32, %arg1: i32) -> (i32, i32) {
    %c0_i32 = arith.constant 0 : i32
    return %arg0, %arg1 : i32, i32
  }
  func.func @transform_2(%arg0: i32, %arg1: i32) -> (i32, i32) {
    %c0_i32 = arith.constant 0 : i32
    %c0_i32_0 = arith.constant 0 : i32
    return %arg0, %c0_i32 : i32, i32
  }
}

</mosaic_0001>

<bundles_post_ra>
// kernel: tpu_custom_call.1
= control target key start
LH: loop header
LB: loop body
LE: loop exit
PB: predicated region body
PF: predicated region fallthrough
CT: control target
= control target key end

     0   :  { %7 = vsyncpa [#allocation4], 0  ;;  %s186_s0 = inlined_call_operand.hbm [shape: f32[2,1024], index: 0, kind: input, shape index: {}]   ;;  %s187_s1 = inlined_call_operand.hbm [shape: f32[2,1024], index: 1, kind: input, shape index: {}]   ;;  %s188_s2 = inlined_call_operand.vmem [shape: f32[2,1], index: 2, kind: output, shape index: {}]  }
   0x1   :  { %s14_s11 = sshll.u32 %s186_s0, 4  ;;  %s15_s11 = int_to_ptr.hbm [resolvable:$true] %s14_s11 }
   0x2   :  { %8 = vsyncpa [#allocation6], 0  ;;  %s159_s12 = smov [#allocation3]   ;;  %s25_s16 = sshll.u32 %s187_s1, 4  ;;  %s26_s16 = int_to_ptr.hbm [resolvable:$true] %s25_s16 }
   0x3   :  { %s16_s13 = sshll.u32 %s159_s12, 4  ;;  %s160_s17 = smov [#allocation5]   ;;  %s17_s13 = int_to_ptr.vmem [resolvable:$true] %s16_s13 }
   0x4   :  { %19 = dma.hbm_to_vmem [thread:$0]  %s15_s11, 256, %s17_s13, [#allocation4]  }
   0x5   :  { %s27_s18 = sshll.u32 %s160_s17, 4  ;;  %s28_s18 = int_to_ptr.vmem [resolvable:$true] %s27_s18 }
   0x6   :  { %30 = dma.hbm_to_vmem [thread:$0]  %s26_s16, 256, %s28_s18, [#allocation6]  }
   0x7   :  { %155 = dma.done.wait [#allocation4], 256  }
   0x8   :  { %156 = vsyncadd [#allocation4], 4294967040 }
   0x9   :  { %157 = dma.done.wait [#allocation6], 256  }
   0xa   :  { %158 = vsyncadd [#allocation6], 4294967040  ;;  %v161_v0 = vmov 0.0   ;;  %v44_v1 = vld [vmem:[#allocation3] sm:$0x3]  ;;  %vm91_vm0 = vcmask 1041408  }
   0xb   :  { %43 = vst [vmem:[#allocation2] sm:$0x3] %v161_v0  ;;  %v45_v2 = vld [vmem:[#allocation5] sm:$0x3]  ;;  %v49_v3 = vld [vmem:[#allocation3 + $0x2] sm:$0x3] }
   0xc   :  { %v46_v4 = vsub.f32 %v44_v1, %v45_v2  ;;  %v50_v5 = vld [vmem:[#allocation5 + $0x2] sm:$0x3]  ;;  %v54_v6 = vld [vmem:[#allocation3 + $0x4] sm:$0x3]  ;;  %v55_v7 = vld [vmem:[#allocation5 + $0x4] sm:$0x3] }
   0xd   :  { %v51_v8 = vsub.f32 %v49_v3, %v50_v5  ;;  %v56_v9 = vsub.f32 %v54_v6, %v55_v7  ;;  %v59_v10 = vld [vmem:[#allocation3 + $0x6] sm:$0x3]  ;;  %v60_v11 = vld [vmem:[#allocation5 + $0x6] sm:$0x3]  ;;  %v64_v12 = vld [vmem:[#allocation3 + $0x8] sm:$0x3] }
   0xe   :  { %v47_v13 = vmul.f32 %v46_v4, %v46_v4  ;;  %v61_v14 = vsub.f32 %v59_v10, %v60_v11  ;;  %v65_v15 = vld [vmem:[#allocation5 + $0x8] sm:$0x3]  ;;  %v69_v16 = vld [vmem:[#allocation3 + $0xa] sm:$0x3]  ;;  %v70_v17 = vld [vmem:[#allocation5 + $0xa] sm:$0x3] }
   0xf   :  { %v52_v18 = vmul.f32 %v51_v8, %v51_v8  ;;  %v57_v19 = vmul.f32 %v56_v9, %v56_v9  ;;  %v66_v20 = vsub.f32 %v64_v12, %v65_v15  ;;  %v74_v21 = vld [vmem:[#allocation3 + $0xc] sm:$0x3]  ;;  %v75_v22 = vld [vmem:[#allocation5 + $0xc] sm:$0x3]  ;;  %v71_v25 = vsub.f32 %v69_v16, %v70_v17  ;;  %v79_v26 = vld [vmem:[#allocation3 + $0xe] sm:$0x3] }
  0x10   :  { %v62_v24 = vmul.f32 %v61_v14, %v61_v14  ;;  %v80_v27 = vld [vmem:[#allocation5 + $0xe] sm:$0x3]  ;;  %v76_v30 = vsub.f32 %v74_v21, %v75_v22  ;;  %vm96_vm1 = vcmask 1024  }
  0x11   :  { %v53_v23 = vadd.f32 %v52_v18, %v47_v13  ;;  %v67_v29 = vmul.f32 %v66_v20, %v66_v20  ;;  %v72_v32 = vmul.f32 %v71_v25, %v71_v25  ;;  %v81_v33 = vsub.f32 %v79_v26, %v80_v27 }
  0x12   :  { %v77_v35 = vmul.f32 %v76_v30, %v76_v30  ;;  %v84_v39 = vld [vmem:[#allocation2] sm:$0x3] }
  0x13   :  { %v58_v28 = vadd.f32 %v57_v19, %v53_v23  ;;  %v82_v37 = vmul.f32 %v81_v33, %v81_v33 }
  0x15   :  { %v63_v31 = vadd.f32 %v62_v24, %v58_v28 }
  0x17   :  { %v68_v34 = vadd.f32 %v67_v29, %v63_v31 }
  0x19   :  { %v73_v36 = vadd.f32 %v72_v32, %v68_v34 }
  0x1b   :  { %v78_v38 = vadd.f32 %v77_v35, %v73_v36 }
  0x1d   :  { %v83_v40 = vadd.f32 %v82_v37, %v78_v38 }
  0x1f   :  { %v85_v41 = vadd.f32 %v84_v39, %v83_v40 }
  0x21   :  { %86 = vst [vmem:[#allocation2] sm:$0x3] %v85_v41 }
  0x28   :  { %v90_v42 = vld [vmem:[#allocation2] sm:$0x3] }
  0x29   :  { %v92_v43 = vsel %vm91_vm0, %v90_v42, 0.0 }
  0x2a   :  { %93 = vadd.xlane.f32.xlu0 %v92_v43 }
  0x9d   :  { %v94_v44 = vpop.xlane.xlu0 %93 }
  0x9e   :  { %v95_v45 = vmul.f32 0.0009765625, %v94_v44 }
  0xa0   :  { %97 = vst.msk [vmem:[%s188_s2] sm:$0x3] %vm96_vm1, %v95_v45 }
  0xa1   :  { %102 = vsyncpa [#allocation4], 1 }
  0xa2   :  { %103 = vsyncpa [#allocation6], 1 }

</bundles_post_ra>
